<compile_context>
chip_gen: v6e
topology: v6e:2x2x1
jax: 0.10.0
libtpu: 0.0.40
codegen_flags: <defaults>
</compile_context>

<pallas_src>
import math

import jax
import jax.numpy as jnp
from jax.experimental import pallas as pl
from jax.experimental.pallas import tpu as pltpu


def _tpu_vmem_capacity_bytes(default=64 * 1024 * 1024):
    """Physical VMEM per TensorCore; conservative default (v7x = 64 MiB) if unknown."""
    try:
        info = pltpu.get_tpu_info()
        cap = getattr(info, "vmem_capacity_bytes", None)
        if cap:
            return int(cap)
    except Exception:
        pass
    return default


def _choose_tiles(B, S, H, enc_isz, out_isz, use_mask, mask_per_batch, mask_isz,
                  is_general, budget):
    """Pick (batch_tile, query_tile) whose double-buffered footprint fits `budget`."""

    def footprint(tb, ti, sep_q):
        f = 2 * tb * S * H * enc_isz                      # key tile (double-buffered)
        if sep_q:
            f += 2 * tb * ti * H * enc_isz                # separate query tile
        f += 2 * tb * ti * S * out_isz                    # output tile
        if use_mask:
            mb = tb if mask_per_batch else 1
            f += 2 * mb * ti * S * mask_isz               # mask tile (bf16 when 0/1)
        if is_general:
            f += 2 * H * H * enc_isz                      # (H,H) weight
        f += 3 * tb * ti * S * 4 + tb * ti * H * 4        # f32 intermediates
        return f

    # Query tile: prefer full S; otherwise the largest multiple-of-8 divisor of S.
    ti = S
    if footprint(1, S, False) > budget:
        for d in range(S - (S % 8), 7, -8):
            if S % d == 0 and footprint(1, d, True) <= budget:
                ti = d
                break
    sep_q = ti != S

    base = footprint(0, ti, sep_q)
    per_b = footprint(1, ti, sep_q) - base
    tb = max(1, int((budget - base) // max(per_b, 1)))
    tb = min(tb, B)
    # Keep >= 2 grid steps so ('parallel', 'parallel') can use both v7x TensorCores.
    if B >= 2 and (S // ti) * (-(-B // tb)) < 2:
        tb = max(1, (B + 1) // 2)
    while tb > 1 and footprint(tb, ti, sep_q) > budget:
        tb -= 1
    return tb, ti, sep_q, footprint(tb, ti, sep_q)


def _make_kernel(method, gain, eps, use_mask, mask_per_batch, separate_q,
                 use_bf16_matmul):
    def kernel(*refs):
        idx = 0
        q_ref = None
        if separate_q:
            q_ref = refs[idx]; idx += 1
        k_ref = refs[idx]; idx += 1
        w_ref = None
        if method == "general":
            w_ref = refs[idx]; idx += 1
        mask_ref = None
        if use_mask:
            mask_ref = refs[idx]; idx += 1
        out_ref = refs[idx]

        k = k_ref[...]                                 # (tb, S, H)
        q = q_ref[...] if separate_q else k            # (tb, ti, H)
        tb, ti, h = q.shape

        mm_dtype = q.dtype
        if use_bf16_matmul and mm_dtype == jnp.float32:
            mm_dtype = jnp.bfloat16                    # v6e/v7x fast path (opt-in)

        if method == "general":
            # energy[i,j] = e_i^T W e_j == (e_i @ W) . e_j : project the (small) query
            # tile rather than the full key side; gain is already folded into W.
            proj = jax.lax.dot_general(
                q.reshape(tb * ti, h).astype(mm_dtype), w_ref[...].astype(mm_dtype),
                (((1,), (0,)), ((), ())),
                preferred_element_type=jnp.float32,
            ).reshape(tb, ti, h)
            lhs = proj.astype(mm_dtype)
        else:  # 'dot'
            if gain != 1.0:
                lhs = (q.astype(jnp.float32) * gain).astype(mm_dtype)
            else:
                lhs = q.astype(mm_dtype)

        # energy[b,i,j] = lhs[b,i,:] . k[b,j,:]  -- batched MXU matmul, f32 accumulation.
        # TODO(synk): if the Mosaic lowering shows a per-tile XLU transpose of k becoming
        # the binding slot, feed a pre-transposed key operand instead.
        energy = jnp.einsum("bih,bjh->bij", lhs, k.astype(mm_dtype),
                            preferred_element_type=jnp.float32)   # (tb, ti, S) f32

        # Masked softmax over j (torch dim=2), exactly as _masked_softmax does it.
        m = jnp.max(energy, axis=-1, keepdims=True)
        e = jnp.exp(energy - m)
        if mask_ref is not None:
            mask = mask_ref[...].astype(jnp.float32)
            if not mask_per_batch:
                mask = mask[None, :, :]                # shared (ti, S) mask -> broadcast
            e = e * mask
        e = e + eps
        denom = jnp.sum(e, axis=-1, keepdims=True)
        # Exact reciprocal (approx EUP reciprocal removed for correctness).
        out_ref[...] = (e * (1.0 / denom)).astype(out_ref.dtype)

    return kernel


def self_attention_forward(encoder_outputs, softmax_mask=None, weight=None, *,
                           method="general", rescale=False, eps=1e-10,
                           out_dtype=None, use_bf16_matmul=False,
                           block_b=None, block_i=None, vmem_budget_bytes=None):
    """Pallas equivalent of SelfAttention.forward.  Returns attn of shape (B, S, S)."""
    S, B, H = encoder_outputs.shape
    if method == "concat":
        # TODO(synk): 'concat' attention (Linear(2H->H)+tanh+Linear(H->1)) not implemented.
        raise NotImplementedError("concat attention not implemented in Pallas")
    if method not in ("general", "dot"):
        raise NotImplementedError(method)
    if method == "general" and weight is None:
        raise ValueError("method='general' requires the (H, H) Linear weight")

    energy_gain = 1.0 / math.sqrt(H) if rescale else 1.0
    out_dtype = jnp.float32 if out_dtype is None else out_dtype
    use_mask = softmax_mask is not None

    # (B, S, H): H on the lane axis; batch / query-tile are the parallel grid axes.
    # TODO(synk): the (S,B,H)->(B,S,H) transpose still costs one HBM pass; could be
    # folded into the input DMA via allow_input_fusion once validated.
    enc_bsh = jnp.transpose(encoder_outputs, (1, 0, 2))
    enc_isz = jnp.dtype(enc_bsh.dtype).itemsize
    out_isz = jnp.dtype(out_dtype).itemsize

    # Mask: keep the broadcastable shape (no (B,S,S) materialisation); bool/int masks
    # travel as bf16 (exact 0/1, half the DMA bytes of f32).
    mask_arr = None
    mask_per_batch = False
    mask_isz = 0
    if use_mask:
        mask_arr = softmax_mask
        if mask_arr.ndim == 3 and mask_arr.shape[0] == 1:
            mask_arr = mask_arr[0]
        if mask_arr.ndim == 2:
            mask_per_batch = False
        elif mask_arr.ndim == 3:
            mask_per_batch = True
        else:
            raise ValueError(f"unsupported mask rank {mask_arr.ndim}")
        if (jnp.issubdtype(mask_arr.dtype, jnp.bool_)
                or jnp.issubdtype(mask_arr.dtype, jnp.integer)):
            mask_arr = mask_arr.astype(jnp.bfloat16)
        mask_isz = jnp.dtype(mask_arr.dtype).itemsize

    # 'general': fold energy_gain into the tiny (H,H) weight once (KB-sized wrapper op)
    # instead of scaling a (tb*ti, H) tensor every grid step.
    w_eff = None
    if method == "general":
        w_eff = weight
        if energy_gain != 1.0:
            w_eff = (weight.astype(jnp.float32) * energy_gain).astype(weight.dtype)

    # Generation-aware VMEM plan: tile budget ~ physical/4 (v5e/v6e: 32 MiB, v7x: 16 MiB),
    # explicit scoped limit passed to the compiler below.
    phys = _tpu_vmem_capacity_bytes()
    budget = vmem_budget_bytes if vmem_budget_bytes is not None else max(12 << 20, phys // 4)
    tb, ti, sep_q, fp = _choose_tiles(B, S, H, enc_isz, out_isz, use_mask,
                                      mask_per_batch, mask_isz,
                                      method == "general", budget)
    if block_b is not None:
        tb = int(block_b)
    if block_i is not None:
        ti = int(block_i)
        sep_q = ti != S
    if S % ti:
        raise ValueError(f"query tile {ti} must divide S={S}")

    grid_b = -(-B // tb)
    grid_i = S // ti
    B_pad = grid_b * tb
    if B_pad != B:                                   # pad batch instead of shrinking tb
        enc_bsh = jnp.pad(enc_bsh, ((0, B_pad - B), (0, 0), (0, 0)))
        if use_mask and mask_per_batch:
            mask_arr = jnp.pad(mask_arr, ((0, B_pad - B), (0, 0), (0, 0)))

    in_specs = []
    args = []
    if sep_q:
        in_specs.append(pl.BlockSpec((tb, ti, H), lambda b, i: (b, i, 0)))   # query tile
        args.append(enc_bsh)
    in_specs.append(pl.BlockSpec((tb, S, H), lambda b, i: (b, 0, 0)))        # key tile
    args.append(enc_bsh)
    if method == "general":
        in_specs.append(pl.BlockSpec((H, H), lambda b, i: (0, 0)))           # weight
        args.append(w_eff)
    if use_mask:
        if mask_per_batch:
            in_specs.append(pl.BlockSpec((tb, ti, S), lambda b, i: (b, i, 0)))
        else:
            in_specs.append(pl.BlockSpec((ti, S), lambda b, i: (i, 0)))      # resident
        args.append(mask_arr)

    kernel = _make_kernel(method, energy_gain, eps, use_mask, mask_per_batch,
                          sep_q, use_bf16_matmul)

    vmem_limit = int(min(max(2 * fp + (8 << 20), 32 << 20),
                         max(phys - (8 << 20), 32 << 20)))

    out = pl.pallas_call(
        kernel,
        out_shape=jax.ShapeDtypeStruct((B_pad, S, S), out_dtype),
        grid_spec=pltpu.PrefetchScalarGridSpec(
            num_scalar_prefetch=0,
            grid=(grid_b, grid_i),
            in_specs=in_specs,
            out_specs=pl.BlockSpec((tb, ti, S), lambda b, i: (b, i, 0)),
        ),
        compiler_params=pltpu.CompilerParams(
            dimension_semantics=("parallel", "parallel"),
            vmem_limit_bytes=vmem_limit,
        ),
    )(*args)
    return out[:B] if B_pad != B else out


def self_attention_ref(encoder_outputs, softmax_mask=None, weight=None, *,
                       method="general", rescale=False, eps=1e-10):
    """Pure-JAX reference replicating the PyTorch module exactly (full-f32 matmuls)."""
    S, B, H = encoder_outputs.shape
    gain = 1.0 / math.sqrt(H) if rescale else 1.0
    hi = jax.lax.Precision.HIGHEST
    enc_b = jnp.transpose(encoder_outputs, (1, 0, 2)).astype(jnp.float32)   # (B, S, H)
    if method == "general":
        proj = jnp.einsum("bjh,oh->bjo", enc_b, weight.astype(jnp.float32), precision=hi)
    elif method == "dot":
        proj = enc_b
    else:
        raise NotImplementedError(method)
    energy = jnp.einsum("bih,bjh->bij", enc_b, proj, precision=hi) * gain    # (B, S, S)
    m = jnp.max(energy, axis=-1, keepdims=True)
    e = jnp.exp(energy - m)
    if softmax_mask is not None:
        e = e * jnp.broadcast_to(softmax_mask, e.shape).astype(jnp.float32)
    e = e + eps
    return e / jnp.sum(e, axis=-1, keepdims=True)


if __name__ == "__main__":
    S, B, H = 8, 2, 32
    key = jax.random.PRNGKey(0)
    k_e, k_w, k_m1, k_m2 = jax.random.split(key, 4)

    encoder_outputs = 0.5 * jax.random.normal(k_e, (S, B, H), jnp.float32)
    bound = 1.0 / math.sqrt(H)      # nn.Linear(H, H, bias=False) default init range
    weight = jax.random.uniform(k_w, (H, H), jnp.float32, -bound, bound)
    mask_b = jax.random.uniform(k_m1, (B, S, S)) < 0.7       # per-batch bool mask
    mask_s = jax.random.uniform(k_m2, (S, S)) < 0.8          # shared (S, S) bool mask

    # 1) method='general', rescale=True, per-batch mask.
    out_gen = self_attention_forward(encoder_outputs, mask_b, weight,
                                     method="general", rescale=True)
    jax.block_until_ready(out_gen)
    ref_gen = self_attention_ref(encoder_outputs, mask_b, weight,
                                 method="general", rescale=True)
    assert out_gen.shape == (B, S, S)
    assert jnp.allclose(out_gen, ref_gen, rtol=2e-2, atol=1e-3), "general mismatch"

    # 2) method='dot', rescale=True, shared (S,S) mask (DMA'd once, broadcast in-kernel).
    out_dot = self_attention_forward(encoder_outputs, mask_s, None,
                                     method="dot", rescale=True)
    jax.block_until_ready(out_dot)
    ref_dot = self_attention_ref(encoder_outputs, mask_s, None,
                                 method="dot", rescale=True)
    assert jnp.allclose(out_dot, ref_dot, rtol=2e-2, atol=1e-3), "dot mismatch"

    # 3) no mask (equivalent to an all-ones mask; no mask DMA issued).
    out_nm = self_attention_forward(encoder_outputs, None, weight,
                                    method="general", rescale=True)
    jax.block_until_ready(out_nm)
    ref_nm = self_attention_ref(encoder_outputs, None, weight,
                                method="general", rescale=True)
    assert jnp.allclose(out_nm, ref_nm, rtol=2e-2, atol=1e-3), "unmasked mismatch"
    rs = jnp.sum(out_nm, axis=-1)
    assert jnp.allclose(rs, jnp.ones_like(rs), atol=1e-3), "rows not normalised"

    # 4) bf16 end-to-end (bf16 inputs, weight, mask and bf16 output): finiteness + norm.
    out16 = self_attention_forward(encoder_outputs.astype(jnp.bfloat16), mask_b,
                                   weight.astype(jnp.bfloat16),
                                   method="general", rescale=True,
                                   out_dtype=jnp.bfloat16)
    jax.block_until_ready(out16)
    assert out16.shape == (B, S, S) and out16.dtype == jnp.bfloat16
    o32 = out16.astype(jnp.float32)
    assert bool(jnp.all(jnp.isfinite(o32))), "bf16 path produced non-finite values"
    rs16 = jnp.sum(o32, axis=-1)
    assert jnp.allclose(rs16, jnp.ones_like(rs16), atol=5e-2), "bf16 rows not normalised"

    print("KERNEL_OK")
</pallas_src>

<mosaic_0001>
module attributes {stable_mosaic.version = 11 : i64} {
  func.func @kernel(%arg0: i32, %arg1: i32, %arg2: memref<1x8x32xf32, #tpu.memory_space<vmem>>, %arg3: memref<32x32xf32, #tpu.memory_space<vmem>>, %arg4: memref<1x8x8xbf16, #tpu.memory_space<vmem>>, %arg5: memref<1x8x8xf32, #tpu.memory_space<vmem>>) attributes {dimension_semantics = [#tpu.dimension_semantics<parallel>, #tpu.dimension_semantics<parallel>], iteration_bounds = array<i64: 2, 1>, scalar_prefetch = 0 : i64, scratch_operands = 0 : i64, tpu.core_type = #tpu.core_type<tc>, window_params = [{transform_indices = @transform_0, window_bounds = array<i64: 1, 8, 32>}, {pipeline_mode = #tpu.pipeline_mode<synchronous>, transform_indices = @transform_1, window_bounds = array<i64: 32, 32>}, {transform_indices = @transform_2, window_bounds = array<i64: 1, 8, 8>}, {transform_indices = @transform_3, window_bounds = array<i64: 1, 8, 8>}]} {
    %c0 = arith.constant 0 : index
    %c0_0 = arith.constant 0 : index
    %c0_1 = arith.constant 0 : index
    %0 = vector.load %arg2[%c0, %c0_0, %c0_1] : memref<1x8x32xf32, #tpu.memory_space<vmem>>, vector<1x8x32xf32>
    %1 = vector.shape_cast %0 : vector<1x8x32xf32> to vector<8x32xf32>
    %c0_2 = arith.constant 0 : index
    %c0_3 = arith.constant 0 : index
    %2 = vector.load %arg3[%c0_2, %c0_3] : memref<32x32xf32, #tpu.memory_space<vmem>>, vector<32x32xf32>
    %cst = arith.constant dense<0.000000e+00> : vector<8x32xf32>
    %3 = tpu.matmul %1, %2, %cst {dimension_numbers = #tpu.dot_dimension_numbers<[1], [0], [0], [1], [0, 0, 1, 1], [], []>} : vector<8x32xf32>, vector<32x32xf32>, vector<8x32xf32> -> vector<8x32xf32>
    %4 = vector.shape_cast %3 : vector<8x32xf32> to vector<1x8x32xf32>
    "tpu.trace_start"() <{level = 10 : i32, message = "bih,bjh->bij"}> : () -> ()
    %cst_4 = arith.constant dense<0.000000e+00> : vector<1x8x8xf32>
    %5 = tpu.matmul %4, %0, %cst_4 {dimension_numbers = #tpu.dot_dimension_numbers<[2], [2], [1], [1], [0, 0, 0, 1, 1, 1], [0], [0]>} : vector<1x8x32xf32>, vector<1x8x32xf32>, vector<1x8x8xf32> -> vector<1x8x8xf32>
    "tpu.trace_stop"() : () -> ()
    %cst_5 = arith.constant dense<0xFF800000> : vector<1x8xf32>
    %6 = vector.multi_reduction <maximumf>, %5, %cst_5 [2] : vector<1x8x8xf32> to vector<1x8xf32>
    %7 = vector.shape_cast %6 : vector<1x8xf32> to vector<1x8x1xf32>
    %8 = vector.broadcast %7 : vector<1x8x1xf32> to vector<1x8x8xf32>
    %9 = arith.subf %5, %8 : vector<1x8x8xf32>
    %10 = math.exp %9 : vector<1x8x8xf32>
    %c0_6 = arith.constant 0 : index
    %c0_7 = arith.constant 0 : index
    %c0_8 = arith.constant 0 : index
    %11 = vector.load %arg4[%c0_6, %c0_7, %c0_8] : memref<1x8x8xbf16, #tpu.memory_space<vmem>>, vector<1x8x8xbf16>
    %12 = arith.extf %11 : vector<1x8x8xbf16> to vector<1x8x8xf32>
    %13 = arith.mulf %10, %12 : vector<1x8x8xf32>
    %cst_9 = arith.constant 1.000000e-10 : f32
    %14 = vector.broadcast %cst_9 : f32 to vector<1x8x8xf32>
    %15 = arith.addf %13, %14 : vector<1x8x8xf32>
    %cst_10 = arith.constant dense<0.000000e+00> : vector<1x8xf32>
    %16 = vector.multi_reduction <add>, %15, %cst_10 [2] : vector<1x8x8xf32> to vector<1x8xf32>
    %17 = vector.shape_cast %16 : vector<1x8xf32> to vector<1x8x1xf32>
    %cst_11 = arith.constant 1.000000e+00 : f32
    %18 = vector.broadcast %cst_11 : f32 to vector<1x8x1xf32>
    %19 = arith.divf %18, %17 : vector<1x8x1xf32>
    %20 = vector.broadcast %19 : vector<1x8x1xf32> to vector<1x8x8xf32>
    %21 = arith.mulf %15, %20 : vector<1x8x8xf32>
    %c0_12 = arith.constant 0 : index
    %c0_13 = arith.constant 0 : index
    %c0_14 = arith.constant 0 : index
    %22 = vector.load %arg5[%c0_12, %c0_13, %c0_14] : memref<1x8x8xf32, #tpu.memory_space<vmem>>, vector<1x8x8xf32>
    tpu.vector_store %arg5[%c0_12, %c0_13, %c0_14], %21 {strides = array<i32>} : memref<1x8x8xf32, #tpu.memory_space<vmem>>, vector<1x8x8xf32>,
    return
  }
  func.func @transform_0(%arg0: i32, %arg1: i32) -> (i32, i32, i32) {
    %c0_i32 = arith.constant 0 : i32
    %c0_i32_0 = arith.constant 0 : i32
    %c0_i32_1 = arith.constant 0 : i32
    return %arg0, %c0_i32, %c0_i32_0 : i32, i32, i32
  }
  func.func @transform_1(%arg0: i32, %arg1: i32) -> (i32, i32) {
    %c0_i32 = arith.constant 0 : i32
    %c0_i32_0 = arith.constant 0 : i32
    %c0_i32_1 = arith.constant 0 : i32
    return %c0_i32, %c0_i32_0 : i32, i32
  }
  func.func @transform_2(%arg0: i32, %arg1: i32) -> (i32, i32, i32) {
    %c0_i32 = arith.constant 0 : i32
    %c0_i32_0 = arith.constant 0 : i32
    return %arg0, %arg1, %c0_i32 : i32, i32, i32
  }
  func.func @transform_3(%arg0: i32, %arg1: i32) -> (i32, i32, i32) {
    %c0_i32 = arith.constant 0 : i32
    %c0_i32_0 = arith.constant 0 : i32
    return %arg0, %arg1, %c0_i32 : i32, i32, i32
  }
}

</mosaic_0001>

<bundles_post_ra>
// kernel: tpu_custom_call.1
= control target key start
LH: loop header
LB: loop body
LE: loop exit
PB: predicated region body
PF: predicated region fallthrough
CT: control target
= control target key end

     0   :  { %8 = vsyncpa [#allocation3], 0  ;;  %s1077_s0 = inlined_call_operand.hbm [shape: f32[2,8,32], index: 0, kind: input, shape index: {}]   ;;  %s1078_s1 = inlined_call_operand.hbm [shape: f32[32,32], index: 1, kind: input, shape index: {}]   ;;  %s1079_s2 = inlined_call_operand.hbm [shape: bf16[2,8,8], index: 2, kind: input, shape index: {}]   ;;  %s1080_s3 = inlined_call_operand.hbm [shape: f32[2,8,8], index: 3, kind: output, shape index: {}]  }
   0x1   :  { %10 = vsyncpa [#allocation3 + $0x1], 0 }
   0x2   :  { %11 = vsyncpa [#allocation6], 0 }
   0x3   :  { %12 = vsyncpa [#allocation4], 0 }
   0x4   :  { %14 = vsyncpa [#allocation4 + $0x1], 0  ;;  %s877_s12 = smov 0   ;;  %s879_s13 = smov 0  }
   0x5   :  { %s881_s14 = smov 0   ;;  %s883_s15 = smov 0  }
   0x6   :  { %s885_s16 = smov 0   ;;  %s887_s17 = smov 0  }
   0x7 LB: > { %s32_s18 = sadd.s32 1, %s843_s16  ;;  %s39_s19 = sadd.s32 1, %s835_s14  ;;  %s847_s17 = sphi %s887_s17, %s20_s17   ;;  %s843_s16 = sphi %s885_s16, %s1100_s16   ;;  %s839_s15 = sphi %s883_s15, %s1099_s15   ;;  %s835_s14 = sphi %s881_s14, %s1098_s14   ;;  %s831_s13 = sphi %s879_s13, %s1097_s13   ;;  %s827_s12 = sphi %s877_s12, %s1096_s12  }
   0x8   : > { %p34_p0 = scmp.ge.s32.totalorder %s32_s18, 2  ;;  %p46_p1 = scmp.ne.s32.totalorder %s835_s14, %s831_s13 }
   0x9   : > { %p47_p2 = scmp.eq.s32.totalorder %s847_s17, 0  ;;  %p617_p5 = scmp.lt.s32.totalorder %s847_s17, 2 }
   0xa   : > { %s1102_s18 = smov (%p34_p0, %s32_s18), 0  ;;  %s166_s21 = sand.u32 1, %s847_s17  }
   0xb   : > { %p48_p4 = por %p47_p2, %p46_p1  ;;  %s36_s20 = ssub.s32 %s843_s16, %s1102_s18 }
   0xc   : > { %p37_p6 = scmp.eq.s32.totalorder %s36_s20, 0  ;;  %s168_s22 = sand.u32 1, %s835_s14  }
   0xd   : > { %s553_s23 = sshll.u32 %s843_s16, 7  ;;  %s552_s25 = sshll.u32 %s168_s22, 3 }
   0xe   : > { %s925_s24 = scalar_select %p37_p6, %s835_s14, %s39_s19  }
   0xf   : > { %s175_s28 = scalar_lea.hbm %s1077_s0, %s553_s23  ;;  %p932_p7 = pnand %p617_p5, %p48_p4 }
  0x10   : > { %s170_s30 = scalar_lea.vmem [#allocation2], %s552_s25  ;;  %s936_s5 = scalar_lea.sflag [#allocation3], %s166_s21 }
  0x11   : > { %s177_s4 = sshll.u32 %s170_s30, 4  ;;  %p1081_p8 = pneg %p932_p7  ;;  %s178_s4 = int_to_ptr.vmem [resolvable:$true] %s177_s4 }
  0x12   : > { %s690_s6 = scalar_lea.vmem %s178_s4, 128  ;;  %s849_s7 = smov [#allocation2]  }
  0x13   : > { %p691_p9 = scmp.ne.s32.totalorder %s178_s4, %s690_s6  ;;  %s695_s8 = sshll.u32 %s849_s7, 4  ;;  %s696_s8 = int_to_ptr.vmem [resolvable:$false] %s695_s8 }
  0x14   : > { %s697_s9 = scalar_lea.vmem %s696_s8, 256  ;;  %p698_p12 = scmp.lt.s32.totalorder %s178_s4, %s696_s8 }
  0x15   : > { %p693_p10 = pnand %p691_p9, %p1081_p8  ;;  %p699_p13 = scmp.lt.s32.totalorder %s697_s9, %s690_s6 }
  0x17   : > { %p694_p11 = pneg %p693_p10  ;;  %p700_p0 = por %p699_p13, %p698_p12 }
  0x19   : > { %p701_p2 = pnand %p700_p0, %p694_p11 }
  0x1b   : > { %704 = shalt.err (!%p701_p2)
}
  0x1c   : > { %608 = dma.hbm_to_vmem [thread:$0]  (!%p932_p7), %s175_s28, 128, %s178_s4, %s936_s5  }
  0x1d   : > { %s947_s10 = sadd.s32 4294967295, %s847_s17   ;;  %s548_s11 = sadd.s32 4294967294, %s847_s17  }
  0x1e   : > { %p52_p4 = scmp.ne.s32.totalorder %s831_s13, %s827_s12  ;;  %p1082_p5 = scmp.eq.s32.totalorder %s947_s10, 0 }
  0x1f   : > { %p127_p6 = scmp.eq.s32.totalorder %s947_s10, 1  ;;  %p133_p9 = scmp.eq.s32.totalorder %s548_s11, 1 }
  0x20   : > { %p956_p10 = por %p1082_p5, %p52_p4  ;;  %p549_p11 = scmp.ge.s32.totalorder %s847_s17, 1 }
  0x21   : > { %p964_p12 = por %p127_p6, %p46_p1  ;;  %p968_p13 = por %p133_p9, %p52_p4 }
  0x22   : > { %p140_p0 = scmp.lt.s32.totalorder %s847_s17, 3  ;;  %s554_s23 = sshll.u32 %s168_s22, 2 }
  0x23   : > { %s1086_s20 = scalar_select %p964_p12, 1, 0 }
  0x24   : > { %s1087_s21 = scalar_select %p968_p13, 1, 0 }
  0x25   : > { %p975_p2 = pnand %p549_p11, %p140_p0  ;;  %s850_s26 = smov [#allocation5]  }
  0x26   : > { %s152_s27 = sshll.u32 %s850_s26, 4  ;;  %s555_s28 = sshll.u32 %s843_s16, 6  ;;  %s153_s27 = int_to_ptr.vmem [resolvable:$true] %s152_s27 }
  0x27   : > { %p601_p1 = pneg %p975_p2  ;;  %s188_s30 = scalar_lea.vmem [#allocation7], %s554_s23 }
  0x28   : > { %s196_s4 = sshll.u32 %s188_s30, 4  ;;  %s991_s8 = scalar_lea.hbm %s1079_s2, %s555_s28  ;;  %s197_s4 = int_to_ptr.vmem [resolvable:$true] %s196_s4 }
  0x29   : > { %p984_p4 = pnand %p601_p1, %p1082_p5  ;;  %s716_s9 = scalar_lea.vmem %s153_s27, 512 }
  0x2a   : > { %p717_p9 = scmp.ne.s32.totalorder %s153_s27, %s716_s9  ;;  %p724_p3 = scmp.lt.s32.totalorder %s153_s27, %s153_s27 }
  0x2b   : > { %p707_p6 = pneg %p984_p4  ;;  %p725_p8 = scmp.lt.s32.totalorder %s716_s9, %s716_s9 }
  0x2d   : > { %p719_p11 = pnand %p717_p9, %p707_p6  ;;  %p726_p13 = por %p725_p8, %p724_p3 }
  0x2f   : > { %p720_p0 = pneg %p719_p11 }
  0x31   : > { %p727_p1 = pnand %p726_p13, %p720_p0 }
  0x33   : > { %730 = shalt.err (!%p727_p1)
}
  0x34   : > { %s851_s11 = smov 128   ;;  %s852_s23 = smov 8  }
  0x35   : > { %604 = dma.hbm_to_vmem [thread:$0]  (!%p984_p4), %s1078_s1, 512, %s153_s27, [#allocation6], %s851_s11, %s851_s11, %s852_s23  }
  0x36   : > { %s744_s30 = scalar_lea.vmem %s197_s4, 64  ;;  %p1090_p12 = pneg %p932_p7 }
  0x37   : > { %p745_p5 = scmp.ne.s32.totalorder %s197_s4, %s744_s30  ;;  %s853_s7 = smov [#allocation7]  }
  0x38   : > { %s749_s22 = sshll.u32 %s853_s7, 4  ;;  %s750_s22 = int_to_ptr.vmem [resolvable:$false] %s749_s22 }
  0x39   : > { %p747_p6 = pnand %p745_p5, %p1090_p12  ;;  %s751_s9 = scalar_lea.vmem %s750_s22, 128 }
  0x3a   : > { %p752_p3 = scmp.lt.s32.totalorder %s197_s4, %s750_s22  ;;  %p753_p8 = scmp.lt.s32.totalorder %s751_s9, %s744_s30 }
  0x3b   : > { %p748_p9 = pneg %p747_p6 }
  0x3c   : > { %p754_p13 = por %p753_p8, %p752_p3 }
  0x3e   : > { %p755_p11 = pnand %p754_p13, %p748_p9 }
  0x40   : > { %758 = shalt.err (!%p755_p11)
}
  0x41   : > { %611 = dma.hbm_to_vmem [thread:$0]  (!%p932_p7), %s991_s8, 64, %s197_s4, %s936_s5  }
  0x42   : > { %205 = sbr.rel (%p975_p2) target bundleno = 803 (0x323), region = 32  ;;  %s207_s27 = sand.u32 (!%p975_p2), 1, %s947_s10  }
  0x43   : > { %s1011_s6 = sand.u32 (!%p975_p2), 1, %s831_s13   ;;  %s208_s23 = scalar_lea.sflag (!%p975_p2), [#allocation3], %s207_s27 }
  0x44   : > { %s557_s11 = sshll.u32 (!%p975_p2), %s1011_s6, 3 }
  0x45   : > { %s211_s26 = scalar_lea.vmem (!%p975_p2), [#allocation2], %s557_s11 }
  0x47   : > { %810 = dma.done.wait (%p956_p10), %s208_s23, 128  }
  0x48   : > { %812 = vsyncadd (%p956_p10), %s208_s23, 4294967168  ;;  %p1091_p7 = scmp.eq.s32.totalorder %s947_s10, 0 }
  0x4a   : > { %814 = dma.done.wait (%p1091_p7), [#allocation6], 512   ;;  %p1092_p5 = pmov %p1091_p7 }
  0x4b   : > { %s559_s29 = sshll.u32 %s1011_s6, 2 }
  0x4c   : > { %816 = vsyncadd (%p1092_p5), [#allocation6], 4294966784  ;;  %s1025_s5 = scalar_lea.vmem [#allocation7], %s559_s29 }
  0x4d   : > { %818 = dma.done.wait (%p956_p10), %s208_s23, 64  }
  0x4e   : > { %820 = vsyncadd (%p956_p10), %s208_s23, 4294967232  ;;  %v854_v0 = vmov 0.0   ;;  %vm855_vm0 = vmmov 0   ;;  %v256_v1 = vld [vmem:[#allocation5 + $0x18] sm:$0xff]  ;;  %v255_v2 = vld [vmem:[#allocation5 + $0x10] sm:$0xff]  ;;  %vm257_vm1 = vcmask 261120  }
  0x4f   : > { %575 = vmatprep.subr.mxu0 %v854_v0  ;;  %583 = vmatprep.mubr.msk.f32.mxu0 %vm855_vm0, %v854_v0  ;;  %v252_v3 = vld [vmem:[%s211_s26] sm:$0xff]  ;;  %v254_v4 = vld [vmem:[#allocation5 + $0x8] sm:$0xff]  ;;  %v253_v5 = vld [vmem:[#allocation5] sm:$0xff]  ;;  %vm404_vm2 = vcmask 64512   ;;  %s565_s10 = sshll.u32 %s839_s15, 7  ;;  %s251_s19 = scalar_lea.vmem [#allocation8], %s557_s11 }
  0x50   : > { %586 = vmatprep.subr.mxu1 %v854_v0  ;;  %588 = vmatprep.mubr.msk.f32.mxu1 %vm855_vm0, %v854_v0  ;;  %v411_v14 = vld [vmem:[%s1025_s5] sm:$0xf]  ;;  %s437_s25 = sshll.u32 %s251_s19, 4  ;;  %s435_s28 = scalar_lea.hbm %s1080_s3, %s565_s10  ;;  %s438_s25 = int_to_ptr.vmem [resolvable:$true] %s437_s25 }
  0x51   : > { %576 = vmatpush3.msra.mxu0 %v256_v1  ;;  %587 = vmatpush3.xpose.msk.msra.mxu1 %vm257_vm1, %v252_v3  ;;  %v412_v15 = vunpack.c.l.bf16 %v411_v14  ;;  %s423_s30 = scalar_lea.sflag [#allocation4], %s1011_s6  ;;  %s759_s7 = scalar_lea.vmem %s438_s25, 128 }
  0x52   : > { %577 = vmatprep.subr.mxu0 %v854_v0  ;;  %p760_p10 = scmp.ne.s32.totalorder %s438_s25, %s759_s7  ;;  %p1093_p12 = scmp.ne.s32.totalorder %s1086_s20, 0 }
  0x53   : > { %578 = vmatpush3.msra.mxu0 %v255_v2  ;;  %s856_s22 = smov [#allocation8]  }
  0x54   : > { %579 = vmatprep.subr.mxu0 %v854_v0  ;;  %p761_p2 = pnand %p760_p10, %p1093_p12  ;;  %s763_s15 = sshll.u32 %s856_s22, 4  ;;  %s764_s15 = int_to_ptr.vmem [resolvable:$false] %s763_s15 }
  0x55   : > { %580 = vmatpush3.msra.mxu0 %v254_v4  ;;  %s765_s9 = scalar_lea.vmem %s764_s15, 256  ;;  %p766_p0 = scmp.lt.s32.totalorder %s438_s25, %s764_s15 }
  0x56   : > { %581 = vmatprep.subr.mxu0 %v854_v0  ;;  %p762_p4 = pneg %p761_p2  ;;  %p767_p1 = scmp.lt.s32.totalorder %s765_s9, %s759_s7 }
  0x57   : > { %582 = vmatpush3.msra.mxu0 %v253_v5 }
  0x58   : > { %584 = vmatmul.mubr.msk.f32.vlgmr.msra.gmra.mxu0 %vm257_vm1, %v252_v3  ;;  %p768_p6 = por %p767_p1, %p766_p0 }
  0x5a   : > { %p769_p9 = pnand %p768_p6, %p762_p4 }
 0x118   : > { %v327_v6 = vpop.f32.mrf.mxu0 }
 0x119   : > { %589 = vmatmul.mubr.msk.f32.vlgmr.msra.gmra.mxu1 %vm257_vm1, %v327_v6 }
 0x11a   : > { %v585_v7 = vpop.f32.mrf.mxu0 }
 0x1d9   : > { %v400_v8 = vpop.f32.mrf.mxu1 }
 0x1da   : > { %v405_v9 = vsel %vm404_vm2, %v400_v8, -inf }
 0x1db   : > { %406 = vmax.xlane.f32.xlu0 %v405_v9  ;;  %v590_v10 = vpop.f32.mrf.mxu1 }
 0x264   : > { %v407_v11 = vpop.xlane.xlu0 %406 }
 0x265   : > { %v408_v12 = vsub.f32 %v400_v8, %v407_v11 }
 0x267   : > { %v409_v13 = vmul.f32 1.442695, %v408_v12 }
 0x269   : > { %673 = vpow2.f32 %v409_v13 }
 0x276   : > { %v674_v16 = vpop.eup %673 }
 0x277   : > { %v413_v17 = vmul.f32 %v674_v16, %v412_v15 }
 0x279   : > { %v414_v18 = vadd.f32 1e-10, %v413_v17 }
 0x27b   : > { %v415_v19 = vsel %vm404_vm2, %v414_v18, 0.0 }
 0x27c   : > { %416 = vadd.xlane.f32.xlu0 %v415_v19 }
 0x305   : > { %v417_v20 = vpop.xlane.xlu0 %416 }
 0x306   : > { %675 = vrcp.f32 %v417_v20 }
 0x313   : > { %v676_v21 = vpop.eup %675 }
 0x314   : > { %v420_v22 = vmul.f32 %v676_v21, %v414_v18 }
 0x316   : > { %421 = vst.msk [vmem:[%s251_s19] sm:$0xff] %vm404_vm2, %v420_v22 }
 0x317   : > { %772 = shalt.err (!%p769_p9)
}
 0x318   : > { %s773_s27 = scalar_lea.hbm %s435_s28, 128  ;;  %s777_s23 = scalar_lea.hbm %s1080_s3, 256 }
 0x319   : > { %p774_p3 = scmp.ne.s32.totalorder %s435_s28, %s773_s27  ;;  %p778_p11 = scmp.lt.s32.totalorder %s435_s28, %s1080_s3 }
 0x31a   : > { %p779_p7 = scmp.lt.s32.totalorder %s777_s23, %s773_s27 }
 0x31b   : > { %p775_p8 = pnand %p774_p3, %p1093_p12 }
 0x31c   : > { %p780_p5 = por %p779_p7, %p778_p11 }
 0x31d   : > { %p776_p13 = pneg %p775_p8 }
 0x31f   : > { %p781_p10 = pnand %p780_p5, %p776_p13 }
 0x321   : > { %784 = shalt.err (!%p781_p10)
}
 0x322   : > { %599 = dma.vmem_to_hbm [thread:$0]  (%p1093_p12), %s438_s25, 128, %s435_s28, %s423_s30  }
 0x323 PF: > { %s449_s5 = sand.u32 1, %s827_s12   ;;  %p1094_p2 = scmp.ne.s32.totalorder %s1087_s21, 0 }
 0x324   : > { %p1095_p4 = scmp.ge.s32.totalorder %s847_s17, 2  ;;  %s450_s10 = scalar_lea.sflag [#allocation4], %s449_s5 }
 0x326   : > { %p613_p0 = pnand %p1095_p4, %p1094_p2 }
 0x328   : > { %p614_p1 = pneg %p613_p0 }
 0x32a   : > { %822 = dma.done.wait (%p614_p1), %s450_s10, 128  }
 0x32b   : > { %824 = vsyncadd (%p614_p1), %s450_s10, 4294967168  ;;  %s20_s17 = sadd.s32 1, %s847_s17   ;;  %s1096_s12 = smov %s831_s13 }
 0x32c   : > { %p17_p6 = scmp.ge.s32.totalorder %s20_s17, 4   ;;  %s1097_s13 = smov %s835_s14 }
 0x32d   : > { %s1098_s14 = smov %s925_s24  ;;  %s1099_s15 = smov %s843_s16 }
 0x32e   : > { %s1100_s16 = smov %s1102_s18  ;;  %19 = sbr.rel (!%p17_p6) target bundleno = 7 (0x7), region = 92 }
 0x333   :  { %455 = vsyncpa [#allocation3], 1 }
 0x334   :  { %457 = vsyncpa [#allocation3 + $0x1], 1 }
 0x335   :  { %458 = vsyncpa [#allocation6], 1 }
 0x336   :  { %459 = vsyncpa [#allocation4], 1 }
 0x337   :  { %461 = vsyncpa [#allocation4 + $0x1], 1 }

</bundles_post_ra>
